<compile_context>
chip_gen: v7x
topology: tpu7x:2x2x1
jax: 0.10.0
libtpu: 0.0.40
codegen_flags: <defaults>
</compile_context>

<pallas_src>
import functools

import jax
import jax.numpy as jnp
from jax.experimental import pallas as pl
from jax.experimental.pallas import tpu as pltpu

INPUT_SIZE = 4
HIDDEN_SIZE = 20
OUTPUT_SIZE = 1


def _round_up(n, m):
    return ((n + m - 1) // m) * m


def mlp_kernel(xt_ref, w1t_ref, w2_ref, o_ref):
    """out[:, b] = sigmoid(W2^T @ relu(W1^T @ x[:, b])) with batch on lanes.

    xt_ref : (INPUT_SIZE, TILE_B)        input tile, batch on the lane axis
    w1t_ref: (HIDDEN_SIZE, INPUT_SIZE)   W1 transposed, resident across grid
    w2_ref : (HIDDEN_SIZE, OUTPUT_SIZE)  W2, resident across grid
    o_ref  : (OUTPUT_SIZE, TILE_B)       output tile, batch on the lane axis
    """
    xt = xt_ref[...]                                    # (4, TILE_B)
    w1t = w1t_ref[...]                                  # (20, 4)
    w2 = w2_ref[...]                                    # (20, 1)

    # Layer 1 on the VPU: 4 broadcast FMAs (rank-1 updates) instead of an
    # MXU matmul with K=4.
    acc = w1t[:, 0:1] * xt[0:1, :]                      # (20, TILE_B)
    for k in range(1, INPUT_SIZE):
        acc = acc + w1t[:, k:k + 1] * xt[k:k + 1, :]

    z2 = jnp.maximum(acc, 0.0)                          # ReLU

    # Layer 2: elementwise scale by W2, then cross-sublane reduction (XLU).
    z3 = jnp.sum(z2 * w2, axis=0, keepdims=True)        # (1, TILE_B)

    # Sigmoid: exp on the EUP, exact reciprocal (matches torch.sigmoid math).
    out = pl.reciprocal(1.0 + jnp.exp(-z3), approx=False)
    o_ref[...] = out.astype(o_ref.dtype)


@functools.partial(jax.jit, static_argnames=("tile_b",))
def neural_network_forward(x, w1, w2, tile_b=512):
    """x: (B, 4) f32, w1: (4, 20) f32, w2: (20, 1) f32 -> (B, 1) f32."""
    B = x.shape[0]

    # Lane-dense batch tile: a multiple of 128, capped at `tile_b`.
    tile = min(tile_b, _round_up(max(B, 1), 128))
    b_pad = _round_up(B, tile)

    # Layout plumbing outside the kernel: batch goes on the 128-lane axis.
    xt = jnp.transpose(x).astype(jnp.float32)           # (4, B)
    if b_pad != B:
        xt = jnp.pad(xt, ((0, 0), (0, b_pad - B)))      # zero-pad extra columns
    w1t = jnp.transpose(w1).astype(jnp.float32)         # (20, 4)
    w2 = w2.astype(jnp.float32)                         # (20, 1)

    out = pl.pallas_call(
        mlp_kernel,
        out_shape=jax.ShapeDtypeStruct((OUTPUT_SIZE, b_pad), jnp.float32),
        grid=(b_pad // tile,),
        in_specs=[
            # batch tile of the transposed input, batch on lanes
            pl.BlockSpec((INPUT_SIZE, tile), lambda i: (0, i)),
            # weights: full-extent blocks, constant index_map -> VMEM-resident
            pl.BlockSpec((HIDDEN_SIZE, INPUT_SIZE), lambda i: (0, 0)),
            pl.BlockSpec((HIDDEN_SIZE, OUTPUT_SIZE), lambda i: (0, 0)),
        ],
        out_specs=pl.BlockSpec((OUTPUT_SIZE, tile), lambda i: (0, i)),
        compiler_params=pltpu.CompilerParams(
            dimension_semantics=("parallel",),          # shard batch over v7x's 2 TCs
            vmem_limit_bytes=32 * 1024 * 1024,          # safe on v7x's 64 MiB VMEM
        ),
    )(xt, w1t, w2)

    # (1, b_pad) lane-dense slab -> (B, 1), dropping the zero padding.
    return out[:, :B].reshape(B, OUTPUT_SIZE)


if __name__ == "__main__":
    key = jax.random.PRNGKey(0)
    k_x, k_w1, k_w2, k_x2 = jax.random.split(key, 4)

    batch = 8
    x = jax.random.normal(k_x, (batch, INPUT_SIZE), dtype=jnp.float32)
    W1 = jax.random.normal(k_w1, (INPUT_SIZE, HIDDEN_SIZE), dtype=jnp.float32)
    W2 = jax.random.normal(k_w2, (HIDDEN_SIZE, OUTPUT_SIZE), dtype=jnp.float32)

    out = jax.block_until_ready(neural_network_forward(x, W1, W2))
    ref = jax.nn.sigmoid(jnp.maximum(x @ W1, 0.0) @ W2)
    assert out.shape == (batch, OUTPUT_SIZE)
    assert jnp.allclose(out, ref, atol=1e-5, rtol=1e-5)

    # Larger batch: exercises the multi-tile grid and the padding path.
    batch2 = 1000
    x2 = jax.random.normal(k_x2, (batch2, INPUT_SIZE), dtype=jnp.float32)
    out2 = jax.block_until_ready(neural_network_forward(x2, W1, W2))
    ref2 = jax.nn.sigmoid(jnp.maximum(x2 @ W1, 0.0) @ W2)
    assert out2.shape == (batch2, OUTPUT_SIZE)
    assert jnp.allclose(out2, ref2, atol=1e-5, rtol=1e-5)

    print("KERNEL_OK")
</pallas_src>

<mosaic_0001>
module attributes {stable_mosaic.version = 11 : i64} {
  func.func @mlp_kernel(%arg0: i32, %arg1: memref<4x128xf32, #tpu.memory_space<vmem>>, %arg2: memref<20x4xf32, #tpu.memory_space<vmem>>, %arg3: memref<20x1xf32, #tpu.memory_space<vmem>>, %arg4: memref<1x128xf32, #tpu.memory_space<vmem>>) attributes {dimension_semantics = [#tpu.dimension_semantics<parallel>], iteration_bounds = array<i64: 1>, scalar_prefetch = 0 : i64, scratch_operands = 0 : i64, tpu.core_type = #tpu.core_type<tc>, window_params = [{transform_indices = @transform_0, window_bounds = array<i64: 4, 128>}, {pipeline_mode = #tpu.pipeline_mode<synchronous>, transform_indices = @transform_1, window_bounds = array<i64: 20, 4>}, {pipeline_mode = #tpu.pipeline_mode<synchronous>, transform_indices = @transform_2, window_bounds = array<i64: 20, 1>}, {transform_indices = @transform_3, window_bounds = array<i64: 1, 128>}]} {
    %c0 = arith.constant 0 : index
    %c0_0 = arith.constant 0 : index
    %0 = vector.load %arg1[%c0, %c0_0] : memref<4x128xf32, #tpu.memory_space<vmem>>, vector<4x128xf32>
    %c0_1 = arith.constant 0 : index
    %c0_2 = arith.constant 0 : index
    %1 = vector.load %arg2[%c0_1, %c0_2] : memref<20x4xf32, #tpu.memory_space<vmem>>, vector<20x4xf32>
    %c0_3 = arith.constant 0 : index
    %c0_4 = arith.constant 0 : index
    %2 = vector.load %arg3[%c0_3, %c0_4] : memref<20x1xf32, #tpu.memory_space<vmem>>, vector<20x1xf32>
    %3 = vector.extract_strided_slice %1 {offsets = [0, 0], sizes = [20, 1], strides = [1, 1]} : vector<20x4xf32> to vector<20x1xf32>
    %4 = vector.extract_strided_slice %0 {offsets = [0, 0], sizes = [1, 128], strides = [1, 1]} : vector<4x128xf32> to vector<1x128xf32>
    %5 = vector.broadcast %3 : vector<20x1xf32> to vector<20x128xf32>
    %6 = vector.broadcast %4 : vector<1x128xf32> to vector<20x128xf32>
    %7 = arith.mulf %5, %6 : vector<20x128xf32>
    %8 = vector.extract_strided_slice %1 {offsets = [0, 1], sizes = [20, 1], strides = [1, 1]} : vector<20x4xf32> to vector<20x1xf32>
    %9 = vector.extract_strided_slice %0 {offsets = [1, 0], sizes = [1, 128], strides = [1, 1]} : vector<4x128xf32> to vector<1x128xf32>
    %10 = vector.broadcast %8 : vector<20x1xf32> to vector<20x128xf32>
    %11 = vector.broadcast %9 : vector<1x128xf32> to vector<20x128xf32>
    %12 = arith.mulf %10, %11 : vector<20x128xf32>
    %13 = arith.addf %7, %12 : vector<20x128xf32>
    %14 = vector.extract_strided_slice %1 {offsets = [0, 2], sizes = [20, 1], strides = [1, 1]} : vector<20x4xf32> to vector<20x1xf32>
    %15 = vector.extract_strided_slice %0 {offsets = [2, 0], sizes = [1, 128], strides = [1, 1]} : vector<4x128xf32> to vector<1x128xf32>
    %16 = vector.broadcast %14 : vector<20x1xf32> to vector<20x128xf32>
    %17 = vector.broadcast %15 : vector<1x128xf32> to vector<20x128xf32>
    %18 = arith.mulf %16, %17 : vector<20x128xf32>
    %19 = arith.addf %13, %18 : vector<20x128xf32>
    %20 = vector.extract_strided_slice %1 {offsets = [0, 3], sizes = [20, 1], strides = [1, 1]} : vector<20x4xf32> to vector<20x1xf32>
    %21 = vector.extract_strided_slice %0 {offsets = [3, 0], sizes = [1, 128], strides = [1, 1]} : vector<4x128xf32> to vector<1x128xf32>
    %22 = vector.broadcast %20 : vector<20x1xf32> to vector<20x128xf32>
    %23 = vector.broadcast %21 : vector<1x128xf32> to vector<20x128xf32>
    %24 = arith.mulf %22, %23 : vector<20x128xf32>
    %25 = arith.addf %19, %24 : vector<20x128xf32>
    %cst = arith.constant 0.000000e+00 : f32
    %26 = vector.broadcast %cst : f32 to vector<20x128xf32>
    %27 = arith.maximumf %25, %26 : vector<20x128xf32>
    %28 = vector.broadcast %2 : vector<20x1xf32> to vector<20x128xf32>
    %29 = arith.mulf %27, %28 : vector<20x128xf32>
    %cst_5 = arith.constant dense<0.000000e+00> : vector<128xf32>
    %30 = vector.multi_reduction <add>, %29, %cst_5 [0] : vector<20x128xf32> to vector<128xf32>
    %31 = vector.shape_cast %30 : vector<128xf32> to vector<1x128xf32>
    %cst_6 = arith.constant 0.000000e+00 : f32
    %32 = vector.broadcast %cst_6 : f32 to vector<1x128xf32>
    %33 = arith.subf %32, %31 : vector<1x128xf32>
    %34 = math.exp %33 : vector<1x128xf32>
    %cst_7 = arith.constant 1.000000e+00 : f32
    %35 = vector.broadcast %cst_7 : f32 to vector<1x128xf32>
    %36 = arith.addf %35, %34 : vector<1x128xf32>
    %37 = tpu.reciprocal %36 : vector<1x128xf32> -> vector<1x128xf32>
    %c0_8 = arith.constant 0 : index
    %c0_9 = arith.constant 0 : index
    %38 = vector.load %arg4[%c0_8, %c0_9] : memref<1x128xf32, #tpu.memory_space<vmem>>, vector<1x128xf32>
    tpu.vector_store %arg4[%c0_8, %c0_9], %37 {strides = array<i32>} : memref<1x128xf32, #tpu.memory_space<vmem>>, vector<1x128xf32>,
    return
  }
  func.func @transform_0(%arg0: i32) -> (i32, i32) {
    %c0_i32 = arith.constant 0 : i32
    %c0_i32_0 = arith.constant 0 : i32
    return %c0_i32, %arg0 : i32, i32
  }
  func.func @transform_1(%arg0: i32) -> (i32, i32) {
    %c0_i32 = arith.constant 0 : i32
    %c0_i32_0 = arith.constant 0 : i32
    %c0_i32_1 = arith.constant 0 : i32
    return %c0_i32, %c0_i32_0 : i32, i32
  }
  func.func @transform_2(%arg0: i32) -> (i32, i32) {
    %c0_i32 = arith.constant 0 : i32
    %c0_i32_0 = arith.constant 0 : i32
    %c0_i32_1 = arith.constant 0 : i32
    return %c0_i32, %c0_i32_0 : i32, i32
  }
  func.func @transform_3(%arg0: i32) -> (i32, i32) {
    %c0_i32 = arith.constant 0 : i32
    %c0_i32_0 = arith.constant 0 : i32
    return %c0_i32, %arg0 : i32, i32
  }
}

</mosaic_0001>

<bundles_post_ra>
// kernel: neural_network_forward.1
= control target key start
LH: loop header
LB: loop body
LE: loop exit
PB: predicated region body
PF: predicated region fallthrough
CT: control target
= control target key end

     0   :  { %v166_v0 = vmov 1   ;;  %v167_v1 = vmov 0   ;;  %v168_v5 = vmov 2   ;;  %v169_v6 = vmov 3   ;;  %s214_s1 = inlined_call_operand.vmem [shape: f32[20,4], index: 1, kind: input, shape index: {}]   ;;  %s215_s2 = inlined_call_operand.vmem [shape: f32[20,1], index: 2, kind: input, shape index: {}]   ;;  %s216_s0 = inlined_call_operand.vmem [shape: f32[4,128], index: 0, kind: input, shape index: {}]   ;;  %s217_s3 = inlined_call_operand.vmem [shape: f32[1,128], index: 3, kind: output, shape index: {}]  }
   0x1   :  { %155 = vset.pattern.permute.xlu1 %v166_v0  ;;  %154 = vset.pattern.permute.xlu0 %v167_v1  ;;  %v15_v2 = vld [vmem:[%s214_s1] sm:$0xff]  ;;  %v16_v3 = vld [vmem:[%s214_s1 + $0x8] sm:$0xff]  ;;  %v17_v4 = vld [vmem:[%s214_s1 + $0x10] sm:$0xf]  ;;  %v36_v12 = vlaneseq  ;;  %vm131_vm0 = vcmask 1043456  }
   0x2   :  { %44 = vperm.xlu1 %155, %v15_v2   ;;  %23 = vperm.xlu0 %154, %v15_v2   ;;  %v18_v7 = vld [vmem:[%s215_s2] sm:$0xff]  ;;  %v19_v8 = vld [vmem:[%s215_s2 + $0x8] sm:$0xff]  ;;  %v20_v9 = vld [vmem:[%s215_s2 + $0x10] sm:$0xf] }
   0x3   :  { %v37_v15 = vshrl.u32 %v36_v12, 7  ;;  %v14_v20 = vld [vmem:[%s216_s0] sm:$0xf] }
   0x5   :  { %v57_v18 = vsub.s32 1, %v37_v15  ;;  %v38_v19 = vsub.s32 0, %v37_v15  ;;  %v79_v21 = vsub.s32 2, %v37_v15  ;;  %v101_v24 = vsub.s32 3, %v37_v15 }
   0x6   :  { %48 = vperm.xlu1 %155, %v16_v3   ;;  %28 = vperm.xlu0 %154, %v16_v3  }
   0x7   :  { %v58_v25 = vrot.slane %v14_v20, %v57_v18  ;;  %v39_v26 = vrot.slane %v14_v20, %v38_v19  ;;  %v80_v27 = vrot.slane %v14_v20, %v79_v21  ;;  %v102_v29 = vrot.slane %v14_v20, %v101_v24 }
   0xa   :  { %52 = vperm.xlu1 %155, %v17_v4   ;;  %33 = vperm.xlu0 %154, %v17_v4  }
   0xe   :  { %157 = vset.pattern.permute.xlu1 %v168_v5  ;;  %156 = vset.pattern.permute.xlu0 %v168_v5 }
   0xf   :  { %70 = vperm.xlu1 %157, %v16_v3   ;;  %66 = vperm.xlu0 %156, %v15_v2  }
  0x13   :  { %74 = vperm.xlu1 %157, %v17_v4   ;;  %158 = vset.pattern.permute.xlu0 %v169_v6 }
  0x14   :  { %88 = vperm.xlu0 %158, %v15_v2  }
  0x17   :  { %159 = vset.pattern.permute.xlu1 %v169_v6 }
  0x18   :  { %92 = vperm.xlu1 %159, %v16_v3   ;;  %160 = vset.pattern.permute.xlu0 %v167_v1 }
  0x19   :  { %114 = vperm.xlu0 %160, %v18_v7  }
  0x1c   :  { %96 = vperm.xlu1 %159, %v17_v4  }
  0x20   :  { %161 = vset.pattern.permute.xlu1 %v167_v1 }
  0x21   :  { %119 = vperm.xlu1 %161, %v19_v8  }
  0x25   :  { %124 = vperm.xlu1 %161, %v20_v9  }
  0x81   :  { %v45_v10 = vpop.permute.xlu1 %44  ;;  %v24_v11 = vpop.permute.xlu0 %23 }
  0x82   :  { %v59_v30 = vmul.f32 %v58_v25, %v45_v10  ;;  %v40_v31 = vmul.f32 %v39_v26, %v24_v11 }
  0x84   :  { %v62_v40 = vadd.f32 %v59_v30, %v40_v31 }
  0x85   :  { %v49_v13 = vpop.permute.xlu1 %48  ;;  %v29_v14 = vpop.permute.xlu0 %28 }
  0x86   :  { %v60_v32 = vmul.f32 %v58_v25, %v49_v13  ;;  %v41_v33 = vmul.f32 %v39_v26, %v29_v14 }
  0x88   :  { %v63_v41 = vadd.f32 %v60_v32, %v41_v33 }
  0x89   :  { %v53_v16 = vpop.permute.xlu1 %52  ;;  %v34_v17 = vpop.permute.xlu0 %33 }
  0x8a   :  { %v61_v37 = vmul.f32 %v58_v25, %v53_v16  ;;  %v42_v38 = vmul.f32 %v39_v26, %v34_v17 }
  0x8c   :  { %v64_v47 = vadd.f32 %v61_v37, %v42_v38 }
  0x8e   :  { %v71_v22 = vpop.permute.xlu1 %70  ;;  %v67_v23 = vpop.permute.xlu0 %66 }
  0x8f   :  { %v82_v35 = vmul.f32 %v80_v27, %v71_v22  ;;  %v81_v36 = vmul.f32 %v80_v27, %v67_v23 }
  0x91   :  { %v85_v45 = vadd.f32 %v82_v35, %v63_v41  ;;  %v84_v46 = vadd.f32 %v81_v36, %v62_v40 }
  0x92   :  { %v75_v28 = vpop.permute.xlu1 %74 }
  0x93   :  { %v89_v34 = vpop.permute.xlu0 %88  ;;  %v83_v44 = vmul.f32 %v80_v27, %v75_v28 }
  0x94   :  { %v103_v42 = vmul.f32 %v102_v29, %v89_v34 }
  0x95   :  { %v86_v52 = vadd.f32 %v83_v44, %v64_v47 }
  0x96   :  { %v106_v49 = vadd.f32 %v103_v42, %v84_v46 }
  0x97   :  { %v93_v39 = vpop.permute.xlu1 %92 }
  0x98   :  { %v104_v43 = vmul.f32 %v102_v29, %v93_v39  ;;  %v109_v54 = vmax.f32 %v106_v49, 0.0  ;;  %v115_v57 = vpop.permute.xlu0 %114 }
  0x9a   :  { %v107_v50 = vadd.f32 %v104_v43, %v85_v45  ;;  %v127_v60 = vmul.f32 %v115_v57, %v109_v54 }
  0x9b   :  { %v97_v48 = vpop.permute.xlu1 %96 }
  0x9c   :  { %v105_v51 = vmul.f32 %v102_v29, %v97_v48  ;;  %v110_v56 = vmax.f32 %v107_v50, 0.0 }
  0x9e   :  { %v108_v53 = vadd.f32 %v105_v51, %v86_v52 }
  0xa0   :  { %v120_v55 = vpop.permute.xlu1 %119  ;;  %v111_v59 = vmax.f32 %v108_v53, 0.0 }
  0xa1   :  { %v128_v58 = vmul.f32 %v120_v55, %v110_v56 }
  0xa3   :  { %v130_v63 = vadd.f32 %v128_v58, %v127_v60 }
  0xa4   :  { %v125_v61 = vpop.permute.xlu1 %124 }
  0xa5   :  { %v129_v62 = vmul.f32 %v125_v61, %v111_v59 }
  0xa7   :  { %v132_v0 = vsel %vm131_vm0, %v129_v62, 0.0 }
  0xa8   :  { %v133_v1 = vadd.f32 %v132_v0, %v130_v63 }
  0xaa   :  { %v134_v2 = vrot.slane %v133_v1, 4 }
  0xac   :  { %v135_v3 = vadd.f32 %v134_v2, %v133_v1 }
  0xae   :  { %v136_v4 = vrot.slane %v135_v3, 2 }
  0xb0   :  { %v137_v5 = vadd.f32 %v136_v4, %v135_v3 }
  0xb2   :  { %v138_v6 = vrot.slane %v137_v5, 1 }
  0xb4   :  { %v139_v7 = vadd.f32 %v138_v6, %v137_v5 }
  0xb6   :  { %v140_v8 = vsub.f32 0.0, %v139_v7 }
  0xb8   :  { %v141_v9 = vmul.f32 1.442695, %v140_v8 }
  0xba   :  { %162 = vpow2.f32 %v141_v9 }
  0xc4   :  { %v163_v10 = vpop.eup %162 }
  0xc5   :  { %v143_v11 = vadd.f32 1.0, %v163_v10 }
  0xc7   :  { %164 = vrcp.f32 %v143_v11 }
  0xd1   :  { %v165_v12 = vpop.eup %164 }
  0xd2   :  { %145 = vst [vmem:[%s217_s3] sm:$0x1] %v165_v12 }

</bundles_post_ra>
